<compile_context>
chip_gen: v7x
topology: tpu7x:2x2x1
jax: 0.10.0
libtpu: 0.0.40
codegen_flags: <defaults>
</compile_context>

<pallas_src>
import jax
import jax.numpy as jnp
from jax.experimental import pallas as pl
from jax.experimental.pallas import tpu as pltpu


def mixture_kernel(p_ref, v0_ref, v1_ref, v2_ref, o_ref):
    # Gate probabilities live in SMEM (scalar-prefetched); read as scalars.
    w0 = p_ref[0]
    w1 = p_ref[1]
    w2 = p_ref[2]
    # Elementwise weighted mixture (hot path); math promotes to f32 because the
    # gates are f32, then cast explicitly to the output dtype on store.
    o_ref[...] = (
        w0 * v0_ref[...] + w1 * v1_ref[...] + w2 * v2_ref[...]
    ).astype(o_ref.dtype)


_LANE_WIDTHS = (8192, 4096, 2048, 1024, 512, 256, 128)


def _lane_dense_layout(total):
    """Largest lane width (multiple of 128) that evenly tiles `total` elements."""
    for cols in _LANE_WIDTHS:
        if total % cols == 0:
            return total // cols, cols
    return None


def mixture(weights, v0, v1, v2, t=None, *, target_tile_bytes=2 * 1024 * 1024):
    """Pallas equivalent of Mixture.forward.

    num_inputs == 1 in the reference module, so the gate index is always 0;
    `t` is therefore ignored.
    """
    del t
    assert v0.shape == v1.shape == v2.shape
    B, L = v0.shape
    out_dtype = v0.dtype
    itemsize = jnp.dtype(out_dtype).itemsize

    # Gate: tiny 3-element softmax computed once here (fused by XLA), handed to
    # the kernel as SMEM scalars via scalar prefetch.
    probs = jax.nn.softmax(weights.astype(jnp.float32).reshape(3))

    # Lane-dense view: the op is elementwise, so we are free to pick a layout
    # with a wide, 128-aligned last dim (unmasked full-width stores).
    layout = _lane_dense_layout(B * L)
    if layout is not None:
        rows, cols = layout
    else:
        # TODO(synk): B*L not a multiple of 128 -> keep the original layout
        # with full-extent blocks (fine for small shapes; very large ragged
        # shapes would want padding + masking instead).
        rows, cols = B, L

    def as2d(x):
        return x.reshape(rows, cols)

    # Row-blocked tiles of ~target_tile_bytes each (full lane width per block).
    rows_per_tile = max(1, target_tile_bytes // (cols * itemsize))
    if rows >= 8:
        block_rows = max(8, (rows_per_tile // 8) * 8)   # keep (8, 128) tiling
        if block_rows >= rows:
            block_rows = rows                           # full extent
    else:
        block_rows = rows                               # full extent (< 8 rows)
    grid = (pl.cdiv(rows, block_rows),)

    # VMEM budget: 4 streamed arrays x 2 pipeline buffers x tile, plus slack.
    tile_bytes = block_rows * cols * itemsize
    vmem_limit = int(min(max(8 * tile_bytes + (2 << 20), 32 << 20), 64 << 20))

    tile_spec = pl.BlockSpec((block_rows, cols), lambda i, p: (i, 0))

    out2d = pl.pallas_call(
        mixture_kernel,
        out_shape=jax.ShapeDtypeStruct((rows, cols), out_dtype),
        grid_spec=pltpu.PrefetchScalarGridSpec(
            num_scalar_prefetch=1,          # gate probabilities -> SMEM
            grid=grid,
            in_specs=[tile_spec, tile_spec, tile_spec],
            out_specs=tile_spec,
        ),
        compiler_params=pltpu.CompilerParams(
            dimension_semantics=("parallel",),   # shardable across v7x's 2 TCs
            vmem_limit_bytes=vmem_limit,
        ),
    )(probs, as2d(v0), as2d(v1), as2d(v2))

    return out2d.reshape(B, L)


if __name__ == "__main__":
    key = jax.random.PRNGKey(0)
    kw, k0, k1, k2 = jax.random.split(key, 4)

    B, L = 16, 128  # small shapes consistent with the module's forward

    # Deterministic parameter init (analogue of torch.rand(3) in __init__).
    weights = jax.random.uniform(kw, (3,), dtype=jnp.float32)

    v0 = jax.random.normal(k0, (B, L), dtype=jnp.float32)
    v1 = jax.random.normal(k1, (B, L), dtype=jnp.float32)
    v2 = jax.random.normal(k2, (B, L), dtype=jnp.float32)

    out = mixture(weights, v0, v1, v2)
    jax.block_until_ready(out)

    # Pure-JAX reference check.
    p = jax.nn.softmax(weights)
    ref = p[0] * v0 + p[1] * v1 + p[2] * v2
    assert out.shape == (B, L)
    assert jnp.allclose(out, ref, atol=1e-5, rtol=1e-5)

    print("KERNEL_OK")
</pallas_src>

<mosaic_0001>
module attributes {stable_mosaic.version = 11 : i64} {
  func.func @mixture_kernel(%arg0: i32, %arg1: memref<3xf32, #tpu.memory_space<smem>>, %arg2: memref<1x2048xf32, #tpu.memory_space<vmem>>, %arg3: memref<1x2048xf32, #tpu.memory_space<vmem>>, %arg4: memref<1x2048xf32, #tpu.memory_space<vmem>>, %arg5: memref<1x2048xf32, #tpu.memory_space<vmem>>) attributes {dimension_semantics = [#tpu.dimension_semantics<parallel>], iteration_bounds = array<i64: 1>, scalar_prefetch = 1 : i64, scratch_operands = 0 : i64, tpu.core_type = #tpu.core_type<tc>, window_params = [{transform_indices = @transform_0, window_bounds = array<i64: 1, 2048>}, {transform_indices = @transform_1, window_bounds = array<i64: 1, 2048>}, {transform_indices = @transform_2, window_bounds = array<i64: 1, 2048>}, {transform_indices = @transform_3, window_bounds = array<i64: 1, 2048>}]} {
    %c0 = arith.constant 0 : index
    %0 = memref.load %arg1[%c0] : memref<3xf32, #tpu.memory_space<smem>>
    %c1 = arith.constant 1 : index
    %1 = memref.load %arg1[%c1] : memref<3xf32, #tpu.memory_space<smem>>
    %c2 = arith.constant 2 : index
    %2 = memref.load %arg1[%c2] : memref<3xf32, #tpu.memory_space<smem>>
    %c0_0 = arith.constant 0 : index
    %c0_1 = arith.constant 0 : index
    %3 = vector.load %arg2[%c0_0, %c0_1] : memref<1x2048xf32, #tpu.memory_space<vmem>>, vector<1x2048xf32>
    %4 = vector.broadcast %0 : f32 to vector<1x2048xf32>
    %5 = arith.mulf %4, %3 : vector<1x2048xf32>
    %c0_2 = arith.constant 0 : index
    %c0_3 = arith.constant 0 : index
    %6 = vector.load %arg3[%c0_2, %c0_3] : memref<1x2048xf32, #tpu.memory_space<vmem>>, vector<1x2048xf32>
    %7 = vector.broadcast %1 : f32 to vector<1x2048xf32>
    %8 = arith.mulf %7, %6 : vector<1x2048xf32>
    %9 = arith.addf %5, %8 : vector<1x2048xf32>
    %c0_4 = arith.constant 0 : index
    %c0_5 = arith.constant 0 : index
    %10 = vector.load %arg4[%c0_4, %c0_5] : memref<1x2048xf32, #tpu.memory_space<vmem>>, vector<1x2048xf32>
    %11 = vector.broadcast %2 : f32 to vector<1x2048xf32>
    %12 = arith.mulf %11, %10 : vector<1x2048xf32>
    %13 = arith.addf %9, %12 : vector<1x2048xf32>
    %c0_6 = arith.constant 0 : index
    %c0_7 = arith.constant 0 : index
    %14 = vector.load %arg5[%c0_6, %c0_7] : memref<1x2048xf32, #tpu.memory_space<vmem>>, vector<1x2048xf32>
    tpu.vector_store %arg5[%c0_6, %c0_7], %13 {strides = array<i32>} : memref<1x2048xf32, #tpu.memory_space<vmem>>, vector<1x2048xf32>,
    return
  }
  func.func @transform_0(%arg0: i32, %arg1: memref<3xf32, #tpu.memory_space<smem>>) -> (i32, i32) {
    %c0_i32 = arith.constant 0 : i32
    %c0_i32_0 = arith.constant 0 : i32
    return %arg0, %c0_i32 : i32, i32
  }
  func.func @transform_1(%arg0: i32, %arg1: memref<3xf32, #tpu.memory_space<smem>>) -> (i32, i32) {
    %c0_i32 = arith.constant 0 : i32
    %c0_i32_0 = arith.constant 0 : i32
    return %arg0, %c0_i32 : i32, i32
  }
  func.func @transform_2(%arg0: i32, %arg1: memref<3xf32, #tpu.memory_space<smem>>) -> (i32, i32) {
    %c0_i32 = arith.constant 0 : i32
    %c0_i32_0 = arith.constant 0 : i32
    return %arg0, %c0_i32 : i32, i32
  }
  func.func @transform_3(%arg0: i32, %arg1: memref<3xf32, #tpu.memory_space<smem>>) -> (i32, i32) {
    %c0_i32 = arith.constant 0 : i32
    %c0_i32_0 = arith.constant 0 : i32
    return %arg0, %c0_i32 : i32, i32
  }
}

</mosaic_0001>

<bundles_post_ra>
// kernel: tpu_custom_call.1
= control target key start
LH: loop header
LB: loop body
LE: loop exit
PB: predicated region body
PF: predicated region fallthrough
CT: control target
= control target key end

     0   :  { %s298_s0 = inlined_call_operand.hbm [shape: f32[3], index: 0, kind: input, shape index: {}]   ;;  %s299_s1 = inlined_call_operand.hbm [shape: f32[1,2048], index: 1, kind: input, shape index: {}]   ;;  %s300_s2 = inlined_call_operand.hbm [shape: f32[1,2048], index: 2, kind: input, shape index: {}]   ;;  %s301_s3 = inlined_call_operand.hbm [shape: f32[1,2048], index: 3, kind: input, shape index: {}]   ;;  %s302_s4 = inlined_call_operand.hbm [shape: f32[1,2048], index: 4, kind: output, shape index: {}]  }
   0x1   :  { %s102_s17 = scalar_lea.hbm %s298_s0, 16 }
   0x2   :  { %p103_p0 = scmp.ne.s32.totalorder %s298_s0, %s102_s17  ;;  %p106_p1 = scmp.lt.u32.totalorder %s102_s17, %s298_s0 }
   0x4   :  { %p108_p2 = pnand %p106_p1, %p103_p0 }
   0x6   :  { %111 = shalt.err (!%p108_p2)  }
   0x7   :  { %s208_s22 = smov [#allocation3]  }
   0x8   :  { %10 = dma.hbm_to_smem %s298_s0, 16, %s208_s22, [#allocation2] }
   0x9   :  { %200 = dma.done.wait [#allocation2], 16 }
   0xa   :  { %201 = vsyncadd [#allocation2], 4294967280 }
   0xb   :  { %12 = sfence }
   0xc   :  { %13 = vsyncpa [#allocation5], 0 }
   0xd   :  { %14 = vsyncpa [#allocation8], 0 }
   0xe   :  { %15 = vsyncpa [#allocation6], 0  ;;  %s209_s25 = smov [#allocation7]   ;;  %s210_s27 = smov [#allocation4]  }
   0xf   :  { %s32_s26 = sshll.u32 %s209_s25, 4  ;;  %s22_s28 = sshll.u32 %s210_s27, 4  ;;  %s33_s26 = int_to_ptr.vmem [resolvable:$true] %s32_s26  ;;  %s23_s28 = int_to_ptr.vmem [resolvable:$true] %s22_s28 }
  0x10   :  { %s112_s5 = scalar_lea.hbm %s300_s2, 256 }
  0x11   :  { %p113_p3 = scmp.ne.s32.totalorder %s300_s2, %s112_s5  ;;  %p116_p4 = scmp.lt.u32.totalorder %s112_s5, %s300_s2 }
  0x13   :  { %p118_p5 = pnand %p116_p4, %p113_p3 }
  0x15   :  { %121 = shalt.err (!%p118_p5)
}
  0x16   :  { %s122_s9 = scalar_lea.vmem %s33_s26, 256  ;;  %p127_p7 = scmp.lt.s32.totalorder %s33_s26, %s33_s26 }
  0x17   :  { %p123_p6 = scmp.ne.s32.totalorder %s33_s26, %s122_s9  ;;  %p128_p8 = scmp.lt.s32.totalorder %s122_s9, %s122_s9 }
  0x19   :  { %p129_p9 = por %p128_p8, %p127_p7 }
  0x1b   :  { %p130_p10 = pnand %p129_p9, %p123_p6 }
  0x1d   :  { %133 = shalt.err (!%p130_p10)
}
  0x1e   :  { %35 = dma.hbm_to_vmem [thread:$0]  %s300_s2, 256, %s33_s26, [#allocation8]  }
  0x1f   :  { %s134_s14 = scalar_lea.hbm %s299_s1, 256 }
  0x20   :  { %p135_p11 = scmp.ne.s32.totalorder %s299_s1, %s134_s14  ;;  %p138_p12 = scmp.lt.u32.totalorder %s134_s14, %s299_s1 }
  0x22   :  { %p140_p13 = pnand %p138_p12, %p135_p11 }
  0x24   :  { %143 = shalt.err (!%p140_p13)
}
  0x25   :  { %s144_s19 = scalar_lea.vmem %s23_s28, 256  ;;  %p149_p1 = scmp.lt.s32.totalorder %s23_s28, %s23_s28 }
  0x26   :  { %p145_p0 = scmp.ne.s32.totalorder %s23_s28, %s144_s19  ;;  %p150_p2 = scmp.lt.s32.totalorder %s144_s19, %s144_s19 }
  0x28   :  { %p151_p3 = por %p150_p2, %p149_p1 }
  0x2a   :  { %p152_p4 = pnand %p151_p3, %p145_p0 }
  0x2c   :  { %155 = shalt.err (!%p152_p4)
}
  0x2d   :  { %25 = dma.hbm_to_vmem [thread:$0]  %s299_s1, 256, %s23_s28, [#allocation5]  }
  0x2e   :  { %s211_s21 = smov [#allocation9]   ;;  %s156_s25 = scalar_lea.hbm %s301_s3, 256 }
  0x2f   :  { %s42_s22 = sshll.u32 %s211_s21, 4  ;;  %p157_p5 = scmp.ne.s32.totalorder %s301_s3, %s156_s25  ;;  %s43_s22 = int_to_ptr.vmem [resolvable:$true] %s42_s22 }
  0x30   :  { %p160_p6 = scmp.lt.u32.totalorder %s156_s25, %s301_s3 }
  0x32   :  { %p162_p7 = pnand %p160_p6, %p157_p5 }
  0x34   :  { %165 = shalt.err (!%p162_p7)
}
  0x35   :  { %s166_s5 = scalar_lea.vmem %s43_s22, 256  ;;  %p171_p9 = scmp.lt.s32.totalorder %s43_s22, %s43_s22 }
  0x36   :  { %p167_p8 = scmp.ne.s32.totalorder %s43_s22, %s166_s5  ;;  %p172_p10 = scmp.lt.s32.totalorder %s166_s5, %s166_s5 }
  0x38   :  { %p173_p11 = por %p172_p10, %p171_p9 }
  0x3a   :  { %p174_p12 = pnand %p173_p11, %p167_p8 }
  0x3c   :  { %177 = shalt.err (!%p174_p12)
}
  0x3d   :  { %45 = dma.hbm_to_vmem [thread:$0]  %s301_s3, 256, %s43_s22, [#allocation8]  }
  0x3e   :  { %202 = dma.done.wait [#allocation5], 256  }
  0x3f   :  { %203 = vsyncadd [#allocation5], 4294967040 }
  0x40   :  { %204 = dma.done.wait [#allocation8], 512  }
  0x41   :  { %205 = vsyncadd [#allocation8], 4294966784  ;;  %s55_s6 = sld [smem:[#allocation3]]  ;;  %s95_s7 = sld [smem:[#allocation3 + $0x1]]  ;;  %v58_v0 = vld [vmem:[#allocation4] sm:$0xff]  ;;  %v63_v2 = vld [vmem:[#allocation7] sm:$0xff] }
  0x42   :  { %s96_s0 = sld [smem:[#allocation3 + $0x2]]  ;;  %v70_v4 = vld [vmem:[#allocation9] sm:$0xff]  ;;  %v59_v8 = vld [vmem:[#allocation4 + $0x8] sm:$0xff]  ;;  %v64_v9 = vld [vmem:[#allocation7 + $0x8] sm:$0xff]  ;;  %s212_s3 = smov [#allocation10]  }
  0x43   :  { %v71_v10 = vld [vmem:[#allocation9 + $0x8] sm:$0xff]  ;;  %s85_s8 = sshll.u32 %s212_s3, 4  ;;  %s86_s8 = int_to_ptr.vmem [resolvable:$true] %s85_s8 }
  0x44   :  { %s178_s9 = scalar_lea.vmem %s86_s8, 256  ;;  %p183_p0 = scmp.lt.s32.totalorder %s86_s8, %s86_s8 }
  0x45   :  { %p179_p13 = scmp.ne.s32.totalorder %s86_s8, %s178_s9  ;;  %p184_p1 = scmp.lt.s32.totalorder %s178_s9, %s178_s9 }
  0x47   :  { %v60_v1 = vstv %s55_s6  ;;  %v65_v3 = vstv %s95_s7  ;;  %p185_p2 = por %p184_p1, %p183_p0 }
  0x48   :  { %v61_v5 = vmul.f32 %v60_v1, %v58_v0  ;;  %v66_v6 = vmul.f32 %v65_v3, %v63_v2  ;;  %v72_v7 = vstv %s96_s0  ;;  %v62_v12 = vmul.f32 %v60_v1, %v59_v8 }
  0x49   :  { %v73_v11 = vmul.f32 %v72_v7, %v70_v4  ;;  %v67_v13 = vmul.f32 %v65_v3, %v64_v9  ;;  %v74_v14 = vmul.f32 %v72_v7, %v71_v10  ;;  %p186_p3 = pnand %p185_p2, %p179_p13 }
  0x4a   :  { %v68_v15 = vadd.f32 %v66_v6, %v61_v5 }
  0x4b   :  { %v69_v16 = vadd.f32 %v67_v13, %v62_v12 }
  0x4c   :  { %v75_v17 = vadd.f32 %v73_v11, %v68_v15 }
  0x4d   :  { %v76_v18 = vadd.f32 %v74_v14, %v69_v16 }
  0x4e   :  { %77 = vst [vmem:[#allocation10] sm:$0xff] %v75_v17 }
  0x4f   :  { %78 = vst [vmem:[#allocation10 + $0x8] sm:$0xff] %v76_v18 }
  0x50   :  { %189 = shalt.err (!%p186_p3)
}
  0x51   :  { %s190_s12 = scalar_lea.hbm %s302_s4, 256 }
  0x52   :  { %p191_p4 = scmp.ne.s32.totalorder %s302_s4, %s190_s12  ;;  %p194_p5 = scmp.lt.u32.totalorder %s190_s12, %s302_s4 }
  0x54   :  { %p196_p6 = pnand %p194_p5, %p191_p4 }
  0x56   :  { %199 = shalt.err (!%p196_p6)
}
  0x57   :  { %88 = dma.vmem_to_hbm [thread:$0]  %s86_s8, 256, %s302_s4, [#allocation6]  }
  0x58   :  { %206 = dma.done.wait [#allocation6], 256  }
  0x59   :  { %207 = vsyncadd [#allocation6], 4294967040 }
  0x5a   :  { %92 = vsyncpa [#allocation5], 1 }
  0x5b   :  { %93 = vsyncpa [#allocation8], 1 }
  0x5c   :  { %94 = vsyncpa [#allocation6], 1 }

</bundles_post_ra>
